<compile_context>
chip_gen: v5e
topology: v5e:2x2
jax: 0.10.0
libtpu: 0.0.40
codegen_flags: <defaults>
</compile_context>

<pallas_src>
import jax
import jax.numpy as jnp
from jax.experimental import pallas as pl
from jax.experimental.pallas import tpu as pltpu

_LANE = 128
_D_IN = 21
_D_H1 = 21
_D_H2 = 42
_D_OUT = 10

# Row offsets of the (in, out)-layout weight tiles inside the bf16 weight slab.
_W1_ROW = 0
_W2_ROW = 128
_W3_ROW = 256
_W_SLAB_ROWS = 384
_B_SLAB_ROWS = 8  # rows 0..2 hold b1 / b2 / b3 (f32)


def _round_up(n, m):
    return ((n + m - 1) // m) * m


def _mlp_kernel(x_ref, w_ref, b_ref, o_ref):
    # x tile: (tb, 21) f32 -> bf16 for the MXU (accumulation stays f32).
    x = x_ref[...].astype(jnp.bfloat16)

    w1 = w_ref[_W1_ROW:_W1_ROW + _D_IN, :]    # (21, 128) bf16, cols >= 21 zero
    w2 = w_ref[_W2_ROW:_W2_ROW + _LANE, :]    # (128, 128) bf16, rows >= 21 / cols >= 42 zero
    w3 = w_ref[_W3_ROW:_W3_ROW + _LANE, :]    # (128, 128) bf16, rows >= 42 / cols >= 10 zero
    b1 = b_ref[0:1, :]                        # (1, 128) f32, zero-padded
    b2 = b_ref[1:2, :]
    b3 = b_ref[2:3, :]

    # Layer 1: Linear(21 -> 21) + ReLU  (weights already (in, out): no .T).
    h = jnp.dot(x, w1, preferred_element_type=jnp.float32) + b1      # (tb, 128) f32
    h = jnp.maximum(h, 0.0)
    # Layer 2: Linear(21 -> 42) + ReLU.  Zero padding stays exact through the chain.
    h = jnp.dot(h.astype(jnp.bfloat16), w2, preferred_element_type=jnp.float32) + b2
    h = jnp.maximum(h, 0.0)
    # Layer 3: Linear(42 -> 10).
    h = jnp.dot(h.astype(jnp.bfloat16), w3, preferred_element_type=jnp.float32) + b3

    o_ref[...] = h[:, :_D_OUT].astype(o_ref.dtype)


def _pack_params(w1, b1, w2, b2, w3, b3):
    """Pack nn.Linear-convention (out, in) weights into a bf16 (in, out) slab
    plus an f32 bias slab.  Everything is zero-padded to lane-dense tiles."""
    w_slab = jnp.zeros((_W_SLAB_ROWS, _LANE), jnp.bfloat16)
    w_slab = w_slab.at[_W1_ROW:_W1_ROW + _D_IN, :_D_H1].set(w1.T.astype(jnp.bfloat16))
    w_slab = w_slab.at[_W2_ROW:_W2_ROW + _D_H1, :_D_H2].set(w2.T.astype(jnp.bfloat16))
    w_slab = w_slab.at[_W3_ROW:_W3_ROW + _D_H2, :_D_OUT].set(w3.T.astype(jnp.bfloat16))

    b_slab = jnp.zeros((_B_SLAB_ROWS, _LANE), jnp.float32)
    b_slab = b_slab.at[0, :_D_H1].set(b1.astype(jnp.float32))
    b_slab = b_slab.at[1, :_D_H2].set(b2.astype(jnp.float32))
    b_slab = b_slab.at[2, :_D_OUT].set(b3.astype(jnp.float32))
    return w_slab, b_slab


def mlp_forward(x, w1, b1, w2, b2, w3, b3, *, batch_tile=1024):
    """x: (B, 21) f32; weights in nn.Linear convention (out, in). Returns (B, 10) f32."""
    B, d_in = x.shape
    assert d_in == _D_IN
    w_slab, b_slab = _pack_params(w1, b1, w2, b2, w3, b3)

    # Batch tiling: near-even split (bounds round_up over-padding to < 8 rows
    # per block) and >= 2 parallel blocks when B >= 16 so both v7x TCs run.
    min_blocks = 2 if B >= 16 else 1
    n_blocks = max(pl.cdiv(B, batch_tile), min_blocks)
    tb = min(_round_up(pl.cdiv(B, n_blocks), 8), _round_up(batch_tile, 8))
    b_pad = _round_up(B, tb)
    num_blocks = b_pad // tb

    x = x.astype(jnp.float32)
    if b_pad != B:
        x_in = jnp.zeros((b_pad, _D_IN), jnp.float32).at[:B].set(x)
    else:
        x_in = x

    flops = 2 * b_pad * (_D_IN + 2 * _LANE) * _LANE
    bytes_accessed = (x_in.size * 4 + w_slab.size * 2 + b_slab.size * 4
                      + b_pad * _D_OUT * 4)

    out = pl.pallas_call(
        _mlp_kernel,
        out_shape=jax.ShapeDtypeStruct((b_pad, _D_OUT), jnp.float32),
        grid=(num_blocks,),
        in_specs=[
            pl.BlockSpec((tb, _D_IN), lambda i: (i, 0)),            # x tile (narrow, full last dim)
            pl.BlockSpec((_W_SLAB_ROWS, _LANE), lambda i: (0, 0)),  # grid-invariant bf16 weights
            pl.BlockSpec((_B_SLAB_ROWS, _LANE), lambda i: (0, 0)),  # grid-invariant f32 biases
        ],
        out_specs=pl.BlockSpec((tb, _D_OUT), lambda i: (i, 0)),
        compiler_params=pltpu.CompilerParams(
            dimension_semantics=("parallel",)),
        cost_estimate=pl.CostEstimate(
            flops=flops, transcendentals=0, bytes_accessed=bytes_accessed),
    )(x_in, w_slab, b_slab)

    return out[:B] if b_pad != B else out


def reference_forward(x, w1, b1, w2, b2, w3, b3):
    h = jnp.maximum(x @ w1.T + b1, 0.0)
    h = jnp.maximum(h @ w2.T + b2, 0.0)
    return h @ w3.T + b3


if __name__ == "__main__":
    key = jax.random.PRNGKey(0)
    k_x, k_w1, k_b1, k_w2, k_b2, k_w3, k_b3 = jax.random.split(key, 7)

    B = 8
    # Deterministic synthetic parameters (nn.Linear convention: weight is (out, in)).
    x = jax.random.normal(k_x, (B, 21), dtype=jnp.float32)
    w1 = jax.random.normal(k_w1, (21, 21), dtype=jnp.float32) * 0.1
    b1 = jax.random.normal(k_b1, (21,), dtype=jnp.float32) * 0.1
    w2 = jax.random.normal(k_w2, (42, 21), dtype=jnp.float32) * 0.1
    b2 = jax.random.normal(k_b2, (42,), dtype=jnp.float32) * 0.1
    w3 = jax.random.normal(k_w3, (10, 42), dtype=jnp.float32) * 0.1
    b3 = jax.random.normal(k_b3, (10,), dtype=jnp.float32) * 0.1

    out = mlp_forward(x, w1, b1, w2, b2, w3, b3)
    out = jax.block_until_ready(out)

    ref = reference_forward(x, w1, b1, w2, b2, w3, b3)
    assert out.shape == (B, 10)
    # bf16 MXU inputs (f32 accumulation / bias / ReLU) -> loosened tolerance.
    assert jnp.allclose(out, ref, atol=2e-2, rtol=2e-2)

    print("KERNEL_OK")
</pallas_src>

<mosaic_0001>
module attributes {stable_mosaic.version = 11 : i64} {
  func.func @_mlp_kernel(%arg0: i32, %arg1: memref<8x21xf32, #tpu.memory_space<vmem>>, %arg2: memref<384x128xbf16, #tpu.memory_space<vmem>>, %arg3: memref<8x128xf32, #tpu.memory_space<vmem>>, %arg4: memref<8x10xf32, #tpu.memory_space<vmem>>) attributes {dimension_semantics = [#tpu.dimension_semantics<parallel>], iteration_bounds = array<i64: 1>, scalar_prefetch = 0 : i64, scratch_operands = 0 : i64, tpu.core_type = #tpu.core_type<tc>, window_params = [{transform_indices = @transform_0, window_bounds = array<i64: 8, 21>}, {pipeline_mode = #tpu.pipeline_mode<synchronous>, transform_indices = @transform_1, window_bounds = array<i64: 384, 128>}, {pipeline_mode = #tpu.pipeline_mode<synchronous>, transform_indices = @transform_2, window_bounds = array<i64: 8, 128>}, {transform_indices = @transform_3, window_bounds = array<i64: 8, 10>}]} {
    %c0 = arith.constant 0 : index
    %c0_0 = arith.constant 0 : index
    %0 = vector.load %arg1[%c0, %c0_0] : memref<8x21xf32, #tpu.memory_space<vmem>>, vector<8x21xf32>
    %1 = arith.truncf %0 : vector<8x21xf32> to vector<8x21xbf16>
    %c0_1 = arith.constant 0 : index
    %c0_2 = arith.constant 0 : index
    %2 = vector.load %arg2[%c0_1, %c0_2] : memref<384x128xbf16, #tpu.memory_space<vmem>>, vector<21x128xbf16>
    %c128 = arith.constant 128 : index
    %c0_3 = arith.constant 0 : index
    %3 = vector.load %arg2[%c128, %c0_3] : memref<384x128xbf16, #tpu.memory_space<vmem>>, vector<128x128xbf16>
    %c256 = arith.constant 256 : index
    %c0_4 = arith.constant 0 : index
    %4 = vector.load %arg2[%c256, %c0_4] : memref<384x128xbf16, #tpu.memory_space<vmem>>, vector<128x128xbf16>
    %c0_5 = arith.constant 0 : index
    %c0_6 = arith.constant 0 : index
    %5 = vector.load %arg3[%c0_5, %c0_6] : memref<8x128xf32, #tpu.memory_space<vmem>>, vector<1x128xf32>
    %c1 = arith.constant 1 : index
    %c0_7 = arith.constant 0 : index
    %6 = vector.load %arg3[%c1, %c0_7] : memref<8x128xf32, #tpu.memory_space<vmem>>, vector<1x128xf32>
    %c2 = arith.constant 2 : index
    %c0_8 = arith.constant 0 : index
    %7 = vector.load %arg3[%c2, %c0_8] : memref<8x128xf32, #tpu.memory_space<vmem>>, vector<1x128xf32>
    %cst = arith.constant dense<0.000000e+00> : vector<8x128xf32>
    %8 = tpu.matmul %1, %2, %cst {dimension_numbers = #tpu.dot_dimension_numbers<[1], [0], [0], [1], [0, 0, 1, 1], [], []>} : vector<8x21xbf16>, vector<21x128xbf16>, vector<8x128xf32> -> vector<8x128xf32>
    %9 = vector.broadcast %5 : vector<1x128xf32> to vector<8x128xf32>
    %10 = arith.addf %8, %9 : vector<8x128xf32>
    %cst_9 = arith.constant 0.000000e+00 : f32
    %11 = vector.broadcast %cst_9 : f32 to vector<8x128xf32>
    %12 = arith.maximumf %10, %11 : vector<8x128xf32>
    %13 = arith.truncf %12 : vector<8x128xf32> to vector<8x128xbf16>
    %cst_10 = arith.constant dense<0.000000e+00> : vector<8x128xf32>
    %14 = tpu.matmul %13, %3, %cst_10 {dimension_numbers = #tpu.dot_dimension_numbers<[1], [0], [0], [1], [0, 0, 1, 1], [], []>} : vector<8x128xbf16>, vector<128x128xbf16>, vector<8x128xf32> -> vector<8x128xf32>
    %15 = vector.broadcast %6 : vector<1x128xf32> to vector<8x128xf32>
    %16 = arith.addf %14, %15 : vector<8x128xf32>
    %cst_11 = arith.constant 0.000000e+00 : f32
    %17 = vector.broadcast %cst_11 : f32 to vector<8x128xf32>
    %18 = arith.maximumf %16, %17 : vector<8x128xf32>
    %19 = arith.truncf %18 : vector<8x128xf32> to vector<8x128xbf16>
    %cst_12 = arith.constant dense<0.000000e+00> : vector<8x128xf32>
    %20 = tpu.matmul %19, %4, %cst_12 {dimension_numbers = #tpu.dot_dimension_numbers<[1], [0], [0], [1], [0, 0, 1, 1], [], []>} : vector<8x128xbf16>, vector<128x128xbf16>, vector<8x128xf32> -> vector<8x128xf32>
    %21 = vector.broadcast %7 : vector<1x128xf32> to vector<8x128xf32>
    %22 = arith.addf %20, %21 : vector<8x128xf32>
    %23 = vector.extract_strided_slice %22 {offsets = [0, 0], sizes = [8, 10], strides = [1, 1]} : vector<8x128xf32> to vector<8x10xf32>
    %c0_13 = arith.constant 0 : index
    %c0_14 = arith.constant 0 : index
    %24 = vector.load %arg4[%c0_13, %c0_14] : memref<8x10xf32, #tpu.memory_space<vmem>>, vector<8x10xf32>
    tpu.vector_store %arg4[%c0_13, %c0_14], %23 {strides = array<i32>} : memref<8x10xf32, #tpu.memory_space<vmem>>, vector<8x10xf32>,
    return
  }
  func.func @transform_0(%arg0: i32) -> (i32, i32) {
    %c0_i32 = arith.constant 0 : i32
    %c0_i32_0 = arith.constant 0 : i32
    return %arg0, %c0_i32 : i32, i32
  }
  func.func @transform_1(%arg0: i32) -> (i32, i32) {
    %c0_i32 = arith.constant 0 : i32
    %c0_i32_0 = arith.constant 0 : i32
    %c0_i32_1 = arith.constant 0 : i32
    return %c0_i32, %c0_i32_0 : i32, i32
  }
  func.func @transform_2(%arg0: i32) -> (i32, i32) {
    %c0_i32 = arith.constant 0 : i32
    %c0_i32_0 = arith.constant 0 : i32
    %c0_i32_1 = arith.constant 0 : i32
    return %c0_i32, %c0_i32_0 : i32, i32
  }
  func.func @transform_3(%arg0: i32) -> (i32, i32) {
    %c0_i32 = arith.constant 0 : i32
    %c0_i32_0 = arith.constant 0 : i32
    return %arg0, %c0_i32 : i32, i32
  }
}

</mosaic_0001>

<bundles_post_ra>
// kernel: tpu_custom_call.1
= control target key start
LH: loop header
LB: loop body
LE: loop exit
PB: predicated region body
PF: predicated region fallthrough
CT: control target
= control target key end

     0   :  { %8 = vsyncpa [#allocation3], 0  ;;  %s518_s0 = inlined_call_operand.hbm [shape: f32[8,21], index: 0, kind: input, shape index: {}]   ;;  %s519_s1 = inlined_call_operand.hbm [shape: bf16[384,128], index: 1, kind: input, shape index: {}]   ;;  %s520_s2 = inlined_call_operand.hbm [shape: f32[8,128], index: 2, kind: input, shape index: {}]   ;;  %s521_s3 = inlined_call_operand.hbm [shape: f32[8,10], index: 3, kind: output, shape index: {}]  }
   0x1   :  { %9 = vsyncpa [#allocation6], 0  ;;  %s26_s14 = sshll.u32 %s519_s1, 4  ;;  %s27_s14 = int_to_ptr.hbm [resolvable:$true] %s26_s14 }
   0x2   :  { %10 = vsyncpa [#allocation4], 0  ;;  %s479_s15 = smov [#allocation5]   ;;  %s16_s19 = sshll.u32 %s518_s0, 4  ;;  %s17_s19 = int_to_ptr.hbm [resolvable:$true] %s16_s19 }
   0x3   :  { %s28_s16 = sshll.u32 %s479_s15, 4  ;;  %s480_s20 = smov 64   ;;  %s29_s16 = int_to_ptr.vmem [resolvable:$true] %s28_s16 }
   0x4   :  { %s481_s21 = smov 4   ;;  %s482_s22 = smov [#allocation2]  }
   0x5   :  { %34 = dma.hbm_to_vmem [thread:$0]  %s27_s14, 3072, %s29_s16, [#allocation6], %s480_s20, %s480_s20, %s481_s21  }
   0x6   :  { %s18_s23 = sshll.u32 %s482_s22, 4  ;;  %s40_s26 = sshll.u32 %s520_s2, 4  ;;  %s19_s23 = int_to_ptr.vmem [resolvable:$true] %s18_s23  ;;  %s41_s26 = int_to_ptr.hbm [resolvable:$true] %s40_s26 }
   0x7   :  { %21 = dma.hbm_to_vmem [thread:$0]  %s17_s19, 128, %s19_s23, [#allocation3]  }
   0x8   :  { %s483_s1 = smov [#allocation7]  }
   0x9   :  { %s42_s27 = sshll.u32 %s483_s1, 4  ;;  %s43_s27 = int_to_ptr.vmem [resolvable:$true] %s42_s27 }
   0xa   :  { %45 = dma.hbm_to_vmem [thread:$0]  %s41_s26, 128, %s43_s27, [#allocation6]  }
   0xb   :  { %473 = dma.done.wait [#allocation3], 128  }
   0xc   :  { %474 = vsyncadd [#allocation3], 4294967168 }
   0xd   :  { %475 = dma.done.wait [#allocation6], 3200  }
   0xe   :  { %476 = vsyncadd [#allocation6], 4294964096  ;;  %vm113_vm0 = vcmask 1041408   ;;  %vm114_vm1 = vcmask 1042432   ;;  %v484_v0 = vmov 65535   ;;  %v358_v4 = vld [vmem:[#allocation5 + $0x78] sm:$0xff] }
   0xf   :  { %v115_v1 = vsel %vm113_vm0, 4294967295, %v484_v0  ;;  %v63_v2 = vld [vmem:[#allocation5 + $0x8] sm:$0x7]  ;;  %184 = vmatpush.bf16.msra.mxu1 %v358_v4  ;;  %v357_v7 = vld [vmem:[#allocation5 + $0x70] sm:$0xff]  ;;  %v350_v9 = vld [vmem:[#allocation5] sm:$0xff]  ;;  %vm109_vm2 = vcmask 171008  }
  0x10   :  { %v105_v3 = vunpack.c.l.b16 %v63_v2  ;;  %v116_v5 = vsel %vm114_vm1, %v115_v1, 0  ;;  %v59_v10 = vld [vmem:[#allocation2] sm:$0xff]  ;;  %v356_v11 = vld [vmem:[#allocation5 + $0x68] sm:$0xff]  ;;  %v355_v13 = vld [vmem:[#allocation5 + $0x60] sm:$0xff]  ;;  %s485_s0 = smov [#allocation8]   ;;  %s270_s30 = sshll.u32 %s521_s3, 4  ;;  %s271_s30 = int_to_ptr.hbm [resolvable:$true] %s270_s30 }
  0x11   :  { %v60_v12 = vpack.c.bf16 %v59_v10, %v59_v10  ;;  %v354_v14 = vld [vmem:[#allocation5 + $0x58] sm:$0xff]  ;;  %v353_v15 = vld [vmem:[#allocation5 + $0x50] sm:$0xff]  ;;  %v352_v16 = vld [vmem:[#allocation5 + $0x48] sm:$0xff]  ;;  %s268_s2 = sshll.u32 %s485_s0, 4  ;;  %vm261_vm3 = vcmask 80896   ;;  %s269_s2 = int_to_ptr.vmem [resolvable:$true] %s268_s2 }
  0x12   :  { %v107_v6 = vpack.c.b16 %v105_v3, %v105_v3  ;;  %v351_v17 = vld [vmem:[#allocation5 + $0x40] sm:$0xff]  ;;  %v366_v18 = vld [vmem:[#allocation5 + $0xb8] sm:$0xff]  ;;  %v365_v19 = vld [vmem:[#allocation5 + $0xb0] sm:$0xff] }
  0x13   :  { %185 = vmatpush.bf16.msra.mxu1 %v357_v7  ;;  %248 = vmatpush.bf16.msra.mxu2 %v366_v18  ;;  %v364_v20 = vld [vmem:[#allocation5 + $0xa8] sm:$0xff]  ;;  %v363_v21 = vld [vmem:[#allocation5 + $0xa0] sm:$0xff]  ;;  %v362_v22 = vld [vmem:[#allocation5 + $0x98] sm:$0xff] }
  0x14   :  { %v118_v8 = vand.u32 %v116_v5, %v107_v6  ;;  %v361_v23 = vld [vmem:[#allocation5 + $0x90] sm:$0xff]  ;;  %v374_v24 = vld [vmem:[#allocation7] ss:$0 sm:$0xff]  ;;  %v360_v30 = vld [vmem:[#allocation5 + $0x88] sm:$0xff] }
  0x15   :  { %v359_v31 = vld [vmem:[#allocation5 + $0x80] sm:$0xff] }
  0x16   :  { %126 = vmatpush.bf16.msra.mxu0 %v118_v8  ;;  %v375_v32 = vld [vmem:[#allocation7 + $0x1] ss:$0 sm:$0xff]  ;;  %v376_v38 = vld [vmem:[#allocation7 + $0x2] ss:$0 sm:$0xff] }
  0x17   :  { %186 = vmatpush.bf16.msra.mxu1 %v356_v11  ;;  %249 = vmatpush.bf16.msra.mxu2 %v365_v19 }
  0x1a   :  { %127 = vmatpush.bf16.msra.mxu0 %v350_v9 }
  0x1b   :  { %187 = vmatpush.bf16.msra.mxu1 %v355_v13  ;;  %250 = vmatpush.bf16.msra.mxu2 %v364_v20 }
  0x1d   :  { %285 = vmatmul.msk.bf16.vlgmr.msra.gmra.mxu0 %vm109_vm2, %v60_v12 }
  0x1f   :  { %188 = vmatpush.bf16.msra.mxu1 %v354_v14  ;;  %251 = vmatpush.bf16.msra.mxu2 %v363_v21 }
  0x23   :  { %189 = vmatpush.bf16.msra.mxu1 %v353_v15  ;;  %252 = vmatpush.bf16.msra.mxu2 %v362_v22 }
  0x27   :  { %190 = vmatpush.bf16.msra.mxu1 %v352_v16  ;;  %253 = vmatpush.bf16.msra.mxu2 %v361_v23 }
  0x2b   :  { %191 = vmatpush.bf16.msra.mxu1 %v351_v17  ;;  %254 = vmatpush.bf16.msra.mxu2 %v360_v30 }
  0x2f   :  { %255 = vmatpush.bf16.msra.mxu2 %v359_v31 }
  0x9a   :  { %v129_v25 = vpop.f32.mrf.mxu0 }
  0x9b   :  { %v130_v26 = vadd.f32 %v374_v24, %v129_v25 }
  0x9d   :  { %v133_v27 = vmax.f32 %v130_v26, 0.0 }
  0x9f   :  { %v134_v28 = vpack.c.bf16 %v133_v27, %v133_v27 }
  0xa1   :  { %192 = vmatmul.bf16.vlgmr.msra.gmra.mxu1 %v134_v28 }
  0xa2   :  { %v131_v29 = vpop.f32.mrf.mxu0 }
 0x11e   :  { %v193_v33 = vpop.f32.mrf.mxu1 }
 0x11f   :  { %v194_v34 = vadd.f32 %v375_v32, %v193_v33 }
 0x121   :  { %v197_v35 = vmax.f32 %v194_v34, 0.0 }
 0x123   :  { %v198_v36 = vpack.c.bf16 %v197_v35, %v197_v35 }
 0x125   :  { %256 = vmatmul.bf16.vlgmr.msra.gmra.mxu2 %v198_v36 }
 0x126   :  { %v195_v37 = vpop.f32.mrf.mxu1 }
 0x1a8   :  { %v257_v39 = vpop.f32.mrf.mxu2 }
 0x1a9   :  { %v258_v40 = vadd.f32 %v376_v38, %v257_v39 }
 0x1ab   :  { %262 = vst.msk [vmem:[#allocation8] sm:$0xff] %vm261_vm3, %v258_v40 }
 0x1ac   :  { %273 = dma.vmem_to_hbm [thread:$0]  %s269_s2, 128, %s271_s30, [#allocation4]  }
 0x1b0   :  { %v259_v41 = vpop.f32.mrf.mxu2 }
 0x1b1   :  { %477 = dma.done.wait [#allocation4], 128  }
 0x1b2   :  { %478 = vsyncadd [#allocation4], 4294967168 }
 0x1b3   :  { %278 = vsyncpa [#allocation3], 1 }
 0x1b4   :  { %279 = vsyncpa [#allocation6], 1 }
 0x1b5   :  { %280 = vsyncpa [#allocation4], 1 }

</bundles_post_ra>
